<compile_context>
chip_gen: v5e
topology: v5e:2x2
jax: 0.10.0
libtpu: 0.0.40
codegen_flags: <defaults>
</compile_context>

<pallas_src>
import math

import jax
import jax.numpy as jnp
from jax.experimental import pallas as pl
from jax.experimental.pallas import tpu as pltpu


def _copy_kernel(x_ref, o_ref):
    # Pure identity copy: a reshape/view moves no values in row-major order.
    o_ref[...] = x_ref[...]


_TARGET_BLOCK_BYTES = 2 * 1024 * 1024   # ~2 MiB blocks: HBM-roofline sweet spot
_VMEM_LIMIT_BYTES = 32 * 1024 * 1024    # safe headroom on v5e/v6e (128 MiB) and v7x (64 MiB)


def _choose_slab(total, itemsize):
    """Pick a lane-dense (rows, cols) view of the flat data plus a row tile `tr`."""
    cols = None
    # Prefer a wide 128-multiple lane dim that still leaves >= 8 sublane rows.
    for c in (4096, 2048, 1024, 512, 256, 128):
        if total % c == 0 and total // c >= 8:
            cols = c
            break
    if cols is None:
        for c in (4096, 2048, 1024, 512, 256, 128):
            if total % c == 0:
                cols = c
                break
    if cols is None:
        # Ragged element count (not a multiple of 128): single full-extent block.
        # TODO(synk): for large ragged sizes, split into an aligned body + small tail call.
        return 1, total, 1

    rows = total // cols
    if rows >= 8 and rows % 8 == 0:
        # Grow the row tile in multiples of 8 up to ~2 MiB per block.
        tr = 8
        while rows % (tr * 2) == 0 and (tr * 2) * cols * itemsize <= _TARGET_BLOCK_BYTES:
            tr *= 2
    else:
        tr = rows  # full extent (tiny arrays)

    # Keep >= 2 grid steps when possible so both v7x TensorCores share the copy.
    if rows // tr == 1 and tr % 16 == 0:
        tr //= 2
    return rows, cols, tr


def _pallas_materialize_copy(x, *, donate_input=False):
    """Materializing identity copy of x's elements through VMEM.

    Returns the copied data as a flat (rows, cols) array; the caller applies the
    final (metadata-only) reshape.  `donate_input=True` aliases the output onto
    the input HBM buffer (only useful when the caller actually donates x).
    """
    total = x.size
    itemsize = jnp.dtype(x.dtype).itemsize
    rows, cols, tr = _choose_slab(total, itemsize)
    x2d = jnp.reshape(x, (rows, cols))          # metadata-only (row-major)
    grid = (rows // tr,)

    call = pl.pallas_call(
        _copy_kernel,
        out_shape=jax.ShapeDtypeStruct((rows, cols), x.dtype),
        grid_spec=pltpu.PrefetchScalarGridSpec(
            num_scalar_prefetch=0,
            grid=grid,
            in_specs=[pl.BlockSpec((tr, cols), lambda i: (i, 0))],
            out_specs=pl.BlockSpec((tr, cols), lambda i: (i, 0)),
        ),
        compiler_params=pltpu.CompilerParams(
            dimension_semantics=("parallel",),
            vmem_limit_bytes=_VMEM_LIMIT_BYTES,
        ),
        cost_estimate=pl.CostEstimate(
            flops=0,
            transcendentals=0,
            bytes_accessed=2 * total * itemsize,
        ),
        input_output_aliases=({0: 0} if donate_input else {}),
    )
    return call(x2d)


class Reshape:
    """JAX/Pallas port of the PyTorch Reshape module.

    By default the forward pass is metadata-only (`jnp.reshape`), matching
    torch `.view()` on contiguous tensors with zero data movement.  Set
    `materialize=True` to force the data through the Pallas copy kernel.
    """

    def __init__(self, shape, materialize=False):
        self.shape = list(shape)
        self.materialize = materialize

    def __call__(self, x):
        new_shape = self.shape.copy()
        new_shape[0] = x.shape[0]

        if not self.materialize:
            # Fast path: pure metadata, no HBM traffic (top perf recommendation).
            return jnp.reshape(x, tuple(new_shape))

        # Optional materializing path: lane-dense identity copy through VMEM,
        # then the (metadata-only) final view.
        y_flat = _pallas_materialize_copy(x)
        return jnp.reshape(y_flat, tuple(new_shape))


if __name__ == "__main__":
    key = jax.random.PRNGKey(0)
    # Small NCHW-like input consistent with a segmentation backbone feature map.
    x = jax.random.normal(key, (2, 4, 16, 16), dtype=jnp.float32)
    ref = jnp.reshape(x, (2, 1024))

    # Default (fast) path: metadata-only reshape.
    module = Reshape([1, 4 * 16 * 16])
    y = jax.block_until_ready(module(x))
    assert y.shape == (2, 1024), y.shape
    assert y.dtype == x.dtype
    assert bool(jnp.array_equal(y, ref))

    # Materializing path: exercises the lane-dense Pallas copy kernel on TPU.
    module_mat = Reshape([1, 4 * 16 * 16], materialize=True)
    y_mat = jax.block_until_ready(module_mat(x))
    assert y_mat.shape == (2, 1024), y_mat.shape
    assert y_mat.dtype == x.dtype
    assert bool(jnp.array_equal(y_mat, ref))

    print("KERNEL_OK")
</pallas_src>

<mosaic_0001>
module attributes {stable_mosaic.version = 11 : i64} {
  func.func @_copy_kernel(%arg0: i32, %arg1: memref<8x256xf32, #tpu.memory_space<vmem>>, %arg2: memref<8x256xf32, #tpu.memory_space<vmem>>) attributes {dimension_semantics = [#tpu.dimension_semantics<parallel>], iteration_bounds = array<i64: 1>, scalar_prefetch = 0 : i64, scratch_operands = 0 : i64, tpu.core_type = #tpu.core_type<tc>, window_params = [{transform_indices = @transform_0, window_bounds = array<i64: 8, 256>}, {transform_indices = @transform_1, window_bounds = array<i64: 8, 256>}]} {
    %c0 = arith.constant 0 : index
    %c0_0 = arith.constant 0 : index
    %0 = vector.load %arg1[%c0, %c0_0] : memref<8x256xf32, #tpu.memory_space<vmem>>, vector<8x256xf32>
    %c0_1 = arith.constant 0 : index
    %c0_2 = arith.constant 0 : index
    %1 = vector.load %arg2[%c0_1, %c0_2] : memref<8x256xf32, #tpu.memory_space<vmem>>, vector<8x256xf32>
    tpu.vector_store %arg2[%c0_1, %c0_2], %0 {strides = array<i32>} : memref<8x256xf32, #tpu.memory_space<vmem>>, vector<8x256xf32>,
    return
  }
  func.func @transform_0(%arg0: i32) -> (i32, i32) {
    %c0_i32 = arith.constant 0 : i32
    %c0_i32_0 = arith.constant 0 : i32
    return %arg0, %c0_i32 : i32, i32
  }
  func.func @transform_1(%arg0: i32) -> (i32, i32) {
    %c0_i32 = arith.constant 0 : i32
    %c0_i32_0 = arith.constant 0 : i32
    return %arg0, %c0_i32 : i32, i32
  }
}

</mosaic_0001>

<bundles_post_ra>
// kernel: tpu_custom_call.1
= control target key start
LH: loop header
LB: loop body
LE: loop exit
PB: predicated region body
PF: predicated region fallthrough
CT: control target
= control target key end

     0   :  { %6 = vsyncpa [#allocation3], 0  ;;  %s116_s0 = inlined_call_operand.hbm [shape: f32[8,256], index: 0, kind: input, shape index: {}]   ;;  %s117_s1 = inlined_call_operand.hbm [shape: f32[8,256], index: 1, kind: output, shape index: {}]  }
   0x1   :  { %7 = vsyncpa [#allocation4], 0  ;;  %s13_s8 = sshll.u32 %s116_s0, 4  ;;  %s98_s9 = smov [#allocation2]   ;;  %s14_s8 = int_to_ptr.hbm [resolvable:$true] %s13_s8 }
   0x2   :  { %s15_s10 = sshll.u32 %s98_s9, 4  ;;  %s16_s10 = int_to_ptr.vmem [resolvable:$true] %s15_s10 }
   0x3   :  { %18 = dma.hbm_to_vmem [thread:$0]  %s14_s8, 256, %s16_s10, [#allocation3]  }
   0x4   :  { %94 = dma.done.wait [#allocation3], 256  }
   0x5   :  { %95 = vsyncadd [#allocation3], 4294967040  ;;  %s99_s11 = smov [#allocation5]   ;;  %s34_s15 = sshll.u32 %s117_s1, 4  ;;  %v23_v0 = vld [vmem:[#allocation2] sm:$0xff]  ;;  %v24_v1 = vld [vmem:[#allocation2 + $0x8] sm:$0xff]  ;;  %s35_s15 = int_to_ptr.hbm [resolvable:$true] %s34_s15 }
   0x6   :  { %s32_s12 = sshll.u32 %s99_s11, 4  ;;  %25 = vst [vmem:[#allocation5] sm:$0xff] %v23_v0  ;;  %s33_s12 = int_to_ptr.vmem [resolvable:$true] %s32_s12 }
   0x7   :  { %26 = vst [vmem:[#allocation5 + $0x8] sm:$0xff] %v24_v1 }
   0x8   :  { %37 = dma.vmem_to_hbm [thread:$0]  %s33_s12, 256, %s35_s15, [#allocation4]  }
   0x9   :  { %96 = dma.done.wait [#allocation4], 256  }
   0xa   :  { %97 = vsyncadd [#allocation4], 4294967040 }
   0xb   :  { %42 = vsyncpa [#allocation3], 1 }
   0xc   :  { %43 = vsyncpa [#allocation4], 1 }

</bundles_post_ra>
